<compile_context>
chip_gen: v5e
topology: v5e:2x2
jax: 0.10.0
libtpu: 0.0.40
codegen_flags: <defaults>
</compile_context>

<pallas_src>
import functools

import numpy as np
import jax
import jax.numpy as jnp
from jax import lax
from jax.experimental import pallas as pl
from jax.experimental.pallas import tpu as pltpu


def _round_up(n, m):
    return ((n + m - 1) // m) * m


def _fold_bn_into_conv(w, b, bn, eps):
    """Fold eval-mode BatchNorm1d (running stats) into conv weight / bias."""
    scale = bn["gamma"] / jnp.sqrt(bn["var"] + eps)                   # (C_out,)
    w_f = (w * scale[:, None, None]).astype(jnp.float32)
    b0 = b if b is not None else jnp.zeros_like(bn["beta"])
    b_f = ((b0 - bn["mean"]) * scale + bn["beta"]).astype(jnp.float32)
    return w_f, b_f


# -----------------------------------------------------------------------------
# Fused kernel: one (batch, L-tile) grid step produces a (C_out, tL) output tile.
# -----------------------------------------------------------------------------
def _resblock_kernel(xl_ref, xm_ref, xr_ref, w1_ref, b1_ref, w2_ref, b2_ref,
                     *rest, K, d, p2l, p2r, hl, hw, tL, L, has_downsample):
    if has_downsample:
        wd_ref, bd_ref, o_ref = rest
    else:
        (o_ref,) = rest

    l = pl.program_id(1)
    base = l * tL - hw                   # global x column of window column 0

    # Input window for this tile: [left halo | main tile | right halo], width
    # W = tL + 2*hw.  Zero every column whose global position is outside
    # [0, L): this is conv1's 'same' zero padding AND it neutralizes garbage
    # from partial / edge-clamped blocks.
    xw = jnp.concatenate([xl_ref[0], xm_ref[0], xr_ref[0]],
                         axis=-1).astype(jnp.float32)
    W = tL + 2 * hw
    gx = base + lax.broadcasted_iota(jnp.int32, (1, W), 1)
    xw = jnp.where((gx >= 0) & (gx < L), xw, 0.0)

    # ---- conv1 + folded BN1 + ReLU on an intermediate window of width mid ----
    mid = tL + p2l + p2r
    off0 = hw - hl
    h = jnp.dot(w1_ref[0], xw[:, off0:off0 + mid],
                preferred_element_type=jnp.float32)
    for k in range(1, K):
        o = off0 + k * d
        h = h + jnp.dot(w1_ref[k], xw[:, o:o + mid],
                        preferred_element_type=jnp.float32)
    h = jnp.maximum(h + b1_ref[...], 0.0)

    # conv2's 'same' padding pads conv1's *output* with zeros, so zero every
    # intermediate column whose global position falls outside [0, L).
    gh = (l * tL - p2l) + lax.broadcasted_iota(jnp.int32, (1, mid), 1)
    h = jnp.where((gh >= 0) & (gh < L), h, 0.0)

    # ---- conv2 + folded BN2 on the output tile ----
    y = jnp.dot(w2_ref[0], h[:, 0:tL], preferred_element_type=jnp.float32)
    for k in range(1, K):
        y = y + jnp.dot(w2_ref[k], h[:, k * d:k * d + tL],
                        preferred_element_type=jnp.float32)
    y = y + b2_ref[...]

    # ---- identity / downsample (1x1 conv + folded BNd) path ----
    x_id = xw[:, hw:hw + tL]             # global columns [l*tL, l*tL + tL)
    if has_downsample:
        ident = jnp.dot(wd_ref[...], x_id,
                        preferred_element_type=jnp.float32) + bd_ref[...]
    else:
        ident = x_id

    o_ref[0] = jnp.maximum(y + ident, 0.0).astype(o_ref.dtype)


# -----------------------------------------------------------------------------
# Wrapper
# -----------------------------------------------------------------------------
def residual_block_1d(x, params, *, kernel_size=3, stride=1, dilation=1,
                      eps=1e-5, tile_l_max=2048, vmem_budget_bytes=12 << 20):
    """Inference-mode forward of ResidualBlock1d with padding='same'."""
    # TODO(synk): stride>1 / numeric (asymmetric-crop) padding and training-mode
    # BatchNorm (batch statistics) are not implemented in the kernel.
    assert stride == 1, "padding='same' requires stride=1 (PyTorch restriction)"
    B, C_in, L = x.shape
    K, d = int(kernel_size), int(dilation)

    # Fold eval-mode BatchNorm into the conv weights / biases (init-time glue).
    w1, b1 = _fold_bn_into_conv(params["w1"], params["b1"], params["bn1"], eps)
    w2, b2 = _fold_bn_into_conv(params["w2"], params["b2"], params["bn2"], eps)
    C_out = w1.shape[0]
    has_downsample = (C_in != C_out) or (stride > 1)

    # 'same' padding split (PyTorch puts the extra pad on the right).
    tot = d * (K - 1)
    p1l, p1r = tot // 2, tot - tot // 2
    p2l, p2r = p1l, p1r                                 # conv2: same K, d, stride=1
    hl, hr = p1l + p2l, p1r + p2r                       # fused receptive-field halo
    halo = hl + hr

    # Lane-aligned halo block width (one narrow block per side, not a full tile).
    hw = _round_up(max(hl, hr, 1), 128)

    # VMEM-aware lane-dense tile length (multiple of hw).
    def footprint(tl):
        x_blk = 2 * (C_in * tl + 2 * C_in * hw)         # double-buffered inputs
        o_blk = 2 * (C_out * tl)                        # double-buffered output
        xw_b = C_in * (tl + 2 * hw)                     # concatenated window
        h_b = C_out * (tl + halo)                       # conv1 intermediate
        y_b = C_out * tl
        wts = K * C_out * (C_in + C_out) + C_out * C_in + 4 * C_out
        return 4 * (x_blk + o_blk + xw_b + h_b + y_b + 2 * wts)

    tL = _round_up(min(max(L, 1), tile_l_max), hw)
    while tL > hw and footprint(tL) > vmem_budget_bytes:
        tL -= hw
    # Keep enough grid steps so both v7x TensorCores get work (best effort).
    while tL > hw and B * (-(-L // tL)) < 4:
        tL -= hw
    num_tiles = -(-L // tL)
    nb = tL // hw                       # main-tile length in halo-block units
    n_hw = -(-L // hw)                  # number of hw-wide blocks covering L

    # Per-tap weight layout (K, C_out, C_*): w_ref[k] is a cheap leading-axis load.
    w1t = jnp.transpose(w1, (2, 0, 1))
    w2t = jnp.transpose(w2, (2, 0, 1))
    b1c = b1.reshape(C_out, 1)
    b2c = b2.reshape(C_out, 1)

    const3 = lambda b, l: (0, 0, 0)     # weights stay resident (never re-DMA'd)
    const2 = lambda b, l: (0, 0)

    in_specs = [
        # left halo: hw columns just left of the tile (clamped at l=0, masked)
        pl.BlockSpec((1, C_in, hw),
                     lambda b, l: (b, 0, jnp.maximum(l * nb - 1, 0))),
        # main tile
        pl.BlockSpec((1, C_in, tL), lambda b, l: (b, 0, l)),
        # right halo: hw columns just right of the tile (clamped at the end, masked)
        pl.BlockSpec((1, C_in, hw),
                     lambda b, l: (b, 0, jnp.minimum(l * nb + nb, n_hw - 1))),
        pl.BlockSpec((K, C_out, C_in), const3),          # w1 (BN1 folded)
        pl.BlockSpec((C_out, 1), const2),                # b1
        pl.BlockSpec((K, C_out, C_out), const3),         # w2 (BN2 folded)
        pl.BlockSpec((C_out, 1), const2),                # b2
    ]
    args = [x, x, x, w1t, b1c, w2t, b2c]

    if has_downsample:
        wd, bd = _fold_bn_into_conv(params["wd"], None, params["bnd"], eps)
        wdc = wd[:, :, 0].astype(jnp.float32)            # 1x1 conv -> (C_out, C_in)
        bdc = bd.reshape(C_out, 1).astype(jnp.float32)
        in_specs += [pl.BlockSpec((C_out, C_in), const2),  # wd (BNd folded)
                     pl.BlockSpec((C_out, 1), const2)]     # bd
        args += [wdc, bdc]

    kernel = functools.partial(
        _resblock_kernel, K=K, d=d, p2l=p2l, p2r=p2r, hl=hl, hw=hw, tL=tL, L=L,
        has_downsample=has_downsample)

    # Scoped-VMEM limit derived from the actual footprint (v7x only has 64 MiB).
    vmem_limit = int(min(32 * 1024 * 1024,
                         max(16 * 1024 * 1024, 2 * footprint(tL))))

    out = pl.pallas_call(
        kernel,
        out_shape=jax.ShapeDtypeStruct((B, C_out, L), x.dtype),
        grid_spec=pltpu.PrefetchScalarGridSpec(
            num_scalar_prefetch=0,
            grid=(B, num_tiles),
            in_specs=in_specs,
            out_specs=pl.BlockSpec((1, C_out, tL), lambda b, l: (b, 0, l)),
        ),
        compiler_params=pltpu.CompilerParams(
            dimension_semantics=("parallel", "parallel"),
            vmem_limit_bytes=vmem_limit),
    )(*args)

    return out


# -----------------------------------------------------------------------------
# Pure-JAX reference (eval-mode semantics of the PyTorch module, unfused).
# -----------------------------------------------------------------------------
def _ref_conv1d_same(x, w, b, dilation):
    K = w.shape[-1]
    tot = dilation * (K - 1)
    lp, rp = tot // 2, tot - tot // 2
    out = lax.conv_general_dilated(
        x, w, window_strides=(1,), padding=[(lp, rp)],
        rhs_dilation=(dilation,), dimension_numbers=("NCH", "OIH", "NCH"))
    if b is not None:
        out = out + b[None, :, None]
    return out


def _ref_bn(h, bn, eps):
    inv = bn["gamma"] / jnp.sqrt(bn["var"] + eps)
    return (h - bn["mean"][None, :, None]) * inv[None, :, None] + bn["beta"][None, :, None]


def ref_residual_block_1d(x, params, *, dilation=1, eps=1e-5):
    h = jnp.maximum(
        _ref_bn(_ref_conv1d_same(x, params["w1"], params["b1"], dilation),
                params["bn1"], eps), 0.0)
    y = _ref_bn(_ref_conv1d_same(h, params["w2"], params["b2"], dilation),
                params["bn2"], eps)
    C_out, C_in = params["w1"].shape[0], params["w1"].shape[1]
    if C_in != C_out:
        ident = _ref_bn(_ref_conv1d_same(x, params["wd"], None, 1),
                        params["bnd"], eps)
    else:
        ident = x
    return jnp.maximum(y + ident, 0.0)


def _make_params(key, C_in, C_out, K, with_downsample):
    ks = jax.random.split(key, 18)

    def bn_params(i, c):
        return dict(
            gamma=1.0 + 0.1 * jax.random.normal(ks[i], (c,), jnp.float32),
            beta=0.1 * jax.random.normal(ks[i + 1], (c,), jnp.float32),
            mean=0.1 * jax.random.normal(ks[i + 2], (c,), jnp.float32),
            var=jnp.abs(jax.random.normal(ks[i + 3], (c,), jnp.float32)) + 0.5,
        )

    params = dict(
        w1=0.3 * jax.random.normal(ks[1], (C_out, C_in, K), jnp.float32),
        b1=0.1 * jax.random.normal(ks[2], (C_out,), jnp.float32),
        bn1=bn_params(3, C_out),
        w2=0.3 * jax.random.normal(ks[7], (C_out, C_out, K), jnp.float32),
        b2=0.1 * jax.random.normal(ks[8], (C_out,), jnp.float32),
        bn2=bn_params(9, C_out),
    )
    if with_downsample:
        params["wd"] = 0.3 * jax.random.normal(ks[13], (C_out, C_in, 1), jnp.float32)
        params["bnd"] = bn_params(14, C_out)
    return params


if __name__ == "__main__":
    key = jax.random.PRNGKey(0)
    k0, k1, k2, k3 = jax.random.split(key, 4)

    # Test 1: downsample path (C_in != C_out), tiny length, single partial tile.
    B, C_in, C_out, L, K, dil = 2, 4, 8, 16, 3, 1
    x = jax.random.normal(k0, (B, C_in, L), dtype=jnp.float32)
    params = _make_params(k1, C_in, C_out, K, with_downsample=True)
    out = jax.block_until_ready(
        residual_block_1d(x, params, kernel_size=K, dilation=dil))
    ref = ref_residual_block_1d(x, params, dilation=dil)
    np.testing.assert_allclose(np.asarray(out), np.asarray(ref),
                               rtol=1e-4, atol=1e-4)

    # Test 2: identity path (C_in == C_out), dilation=2, multi-tile with a
    # partial last block (exercises the halo blocks and OOB masks).
    B2, C2, L2, K2, dil2 = 2, 8, 300, 3, 2
    x2 = jax.random.normal(k2, (B2, C2, L2), dtype=jnp.float32)
    params2 = _make_params(k3, C2, C2, K2, with_downsample=False)
    out2 = jax.block_until_ready(
        residual_block_1d(x2, params2, kernel_size=K2, dilation=dil2))
    ref2 = ref_residual_block_1d(x2, params2, dilation=dil2)
    np.testing.assert_allclose(np.asarray(out2), np.asarray(ref2),
                               rtol=1e-4, atol=1e-4)

    print("KERNEL_OK")
</pallas_src>

<mosaic_0001>
module attributes {stable_mosaic.version = 11 : i64} {
  func.func @_resblock_kernel(%arg0: i32, %arg1: i32, %arg2: memref<1x4x128xf32, #tpu.memory_space<vmem>>, %arg3: memref<1x4x128xf32, #tpu.memory_space<vmem>>, %arg4: memref<1x4x128xf32, #tpu.memory_space<vmem>>, %arg5: memref<3x8x4xf32, #tpu.memory_space<vmem>>, %arg6: memref<8x1xf32, #tpu.memory_space<vmem>>, %arg7: memref<3x8x8xf32, #tpu.memory_space<vmem>>, %arg8: memref<8x1xf32, #tpu.memory_space<vmem>>, %arg9: memref<8x4xf32, #tpu.memory_space<vmem>>, %arg10: memref<8x1xf32, #tpu.memory_space<vmem>>, %arg11: memref<1x8x128xf32, #tpu.memory_space<vmem>>) attributes {dimension_semantics = [#tpu.dimension_semantics<parallel>, #tpu.dimension_semantics<parallel>], iteration_bounds = array<i64: 2, 1>, scalar_prefetch = 0 : i64, scratch_operands = 0 : i64, tpu.core_type = #tpu.core_type<tc>, window_params = [{transform_indices = @transform_0, window_bounds = array<i64: 1, 4, 128>}, {transform_indices = @transform_1, window_bounds = array<i64: 1, 4, 128>}, {transform_indices = @transform_2, window_bounds = array<i64: 1, 4, 128>}, {pipeline_mode = #tpu.pipeline_mode<synchronous>, transform_indices = @transform_3, window_bounds = array<i64: 3, 8, 4>}, {pipeline_mode = #tpu.pipeline_mode<synchronous>, transform_indices = @transform_4, window_bounds = array<i64: 8, 1>}, {pipeline_mode = #tpu.pipeline_mode<synchronous>, transform_indices = @transform_5, window_bounds = array<i64: 3, 8, 8>}, {pipeline_mode = #tpu.pipeline_mode<synchronous>, transform_indices = @transform_6, window_bounds = array<i64: 8, 1>}, {pipeline_mode = #tpu.pipeline_mode<synchronous>, transform_indices = @transform_7, window_bounds = array<i64: 8, 4>}, {pipeline_mode = #tpu.pipeline_mode<synchronous>, transform_indices = @transform_8, window_bounds = array<i64: 8, 1>}, {transform_indices = @transform_9, window_bounds = array<i64: 1, 8, 128>}]} {
    %c128_i32 = arith.constant 128 : i32
    %0 = arith.muli %arg1, %c128_i32 : i32
    %c128_i32_0 = arith.constant 128 : i32
    %1 = arith.subi %0, %c128_i32_0 : i32
    %c0 = arith.constant 0 : index
    %c0_1 = arith.constant 0 : index
    %c0_2 = arith.constant 0 : index
    %2 = vector.load %arg2[%c0, %c0_1, %c0_2] : memref<1x4x128xf32, #tpu.memory_space<vmem>>, vector<1x4x128xf32>
    %3 = vector.shape_cast %2 : vector<1x4x128xf32> to vector<4x128xf32>
    %c0_3 = arith.constant 0 : index
    %c0_4 = arith.constant 0 : index
    %c0_5 = arith.constant 0 : index
    %4 = vector.load %arg3[%c0_3, %c0_4, %c0_5] : memref<1x4x128xf32, #tpu.memory_space<vmem>>, vector<1x4x128xf32>
    %5 = vector.shape_cast %4 : vector<1x4x128xf32> to vector<4x128xf32>
    %c0_6 = arith.constant 0 : index
    %c0_7 = arith.constant 0 : index
    %c0_8 = arith.constant 0 : index
    %6 = vector.load %arg4[%c0_6, %c0_7, %c0_8] : memref<1x4x128xf32, #tpu.memory_space<vmem>>, vector<1x4x128xf32>
    %7 = vector.shape_cast %6 : vector<1x4x128xf32> to vector<4x128xf32>
    %8 = tpu.concatenate %3, %5, %7 in 1 : vector<4x128xf32>, vector<4x128xf32>, vector<4x128xf32> -> vector<4x384xf32>
    %9 = tpu.iota {dimensions = array<i32: 1>} : vector<1x384xi32>
    %10 = vector.broadcast %1 : i32 to vector<1x384xi32>
    %11 = arith.addi %10, %9 : vector<1x384xi32>
    %c0_i32 = arith.constant 0 : i32
    %12 = vector.broadcast %c0_i32 : i32 to vector<1x384xi32>
    %13 = arith.cmpi sge, %11, %12 : vector<1x384xi32>
    %c16_i32 = arith.constant 16 : i32
    %14 = vector.broadcast %c16_i32 : i32 to vector<1x384xi32>
    %15 = arith.cmpi slt, %11, %14 : vector<1x384xi32>
    %16 = arith.andi %13, %15 : vector<1x384xi1>
    %cst = arith.constant 0.000000e+00 : f32
    %17 = vector.shape_cast %16 : vector<1x384xi1> to vector<1x384xi1>
    %18 = vector.broadcast %17 : vector<1x384xi1> to vector<4x384xi1>
    %19 = vector.broadcast %cst : f32 to vector<4x384xf32>
    %20 = arith.select %18, %8, %19 : vector<4x384xi1>, vector<4x384xf32>
    %c0_9 = arith.constant 0 : index
    %c0_10 = arith.constant 0 : index
    %c0_11 = arith.constant 0 : index
    %21 = vector.load %arg5[%c0_9, %c0_10, %c0_11] : memref<3x8x4xf32, #tpu.memory_space<vmem>>, vector<1x8x4xf32>
    %22 = vector.shape_cast %21 : vector<1x8x4xf32> to vector<8x4xf32>
    %23 = vector.extract_strided_slice %20 {offsets = [0, 126], sizes = [4, 130], strides = [1, 1]} : vector<4x384xf32> to vector<4x130xf32>
    %cst_12 = arith.constant dense<0.000000e+00> : vector<8x130xf32>
    %24 = tpu.matmul %22, %23, %cst_12 {dimension_numbers = #tpu.dot_dimension_numbers<[1], [0], [0], [1], [0, 0, 1, 1], [], []>} : vector<8x4xf32>, vector<4x130xf32>, vector<8x130xf32> -> vector<8x130xf32>
    %c1 = arith.constant 1 : index
    %c0_13 = arith.constant 0 : index
    %c0_14 = arith.constant 0 : index
    %25 = vector.load %arg5[%c1, %c0_13, %c0_14] : memref<3x8x4xf32, #tpu.memory_space<vmem>>, vector<1x8x4xf32>
    %26 = vector.shape_cast %25 : vector<1x8x4xf32> to vector<8x4xf32>
    %27 = vector.extract_strided_slice %20 {offsets = [0, 127], sizes = [4, 130], strides = [1, 1]} : vector<4x384xf32> to vector<4x130xf32>
    %cst_15 = arith.constant dense<0.000000e+00> : vector<8x130xf32>
    %28 = tpu.matmul %26, %27, %cst_15 {dimension_numbers = #tpu.dot_dimension_numbers<[1], [0], [0], [1], [0, 0, 1, 1], [], []>} : vector<8x4xf32>, vector<4x130xf32>, vector<8x130xf32> -> vector<8x130xf32>
    %29 = arith.addf %24, %28 : vector<8x130xf32>
    %c2 = arith.constant 2 : index
    %c0_16 = arith.constant 0 : index
    %c0_17 = arith.constant 0 : index
    %30 = vector.load %arg5[%c2, %c0_16, %c0_17] : memref<3x8x4xf32, #tpu.memory_space<vmem>>, vector<1x8x4xf32>
    %31 = vector.shape_cast %30 : vector<1x8x4xf32> to vector<8x4xf32>
    %32 = vector.extract_strided_slice %20 {offsets = [0, 128], sizes = [4, 130], strides = [1, 1]} : vector<4x384xf32> to vector<4x130xf32>
    %cst_18 = arith.constant dense<0.000000e+00> : vector<8x130xf32>
    %33 = tpu.matmul %31, %32, %cst_18 {dimension_numbers = #tpu.dot_dimension_numbers<[1], [0], [0], [1], [0, 0, 1, 1], [], []>} : vector<8x4xf32>, vector<4x130xf32>, vector<8x130xf32> -> vector<8x130xf32>
    %34 = arith.addf %29, %33 : vector<8x130xf32>
    %c0_19 = arith.constant 0 : index
    %c0_20 = arith.constant 0 : index
    %35 = vector.load %arg6[%c0_19, %c0_20] : memref<8x1xf32, #tpu.memory_space<vmem>>, vector<8x1xf32>
    %36 = vector.broadcast %35 : vector<8x1xf32> to vector<8x130xf32>
    %37 = arith.addf %34, %36 : vector<8x130xf32>
    %cst_21 = arith.constant 0.000000e+00 : f32
    %38 = vector.broadcast %cst_21 : f32 to vector<8x130xf32>
    %39 = arith.maximumf %37, %38 : vector<8x130xf32>
    %c128_i32_22 = arith.constant 128 : i32
    %40 = arith.muli %arg1, %c128_i32_22 : i32
    %c1_i32 = arith.constant 1 : i32
    %41 = arith.subi %40, %c1_i32 : i32
    %42 = tpu.iota {dimensions = array<i32: 1>} : vector<1x130xi32>
    %43 = vector.broadcast %41 : i32 to vector<1x130xi32>
    %44 = arith.addi %43, %42 : vector<1x130xi32>
    %c0_i32_23 = arith.constant 0 : i32
    %45 = vector.broadcast %c0_i32_23 : i32 to vector<1x130xi32>
    %46 = arith.cmpi sge, %44, %45 : vector<1x130xi32>
    %c16_i32_24 = arith.constant 16 : i32
    %47 = vector.broadcast %c16_i32_24 : i32 to vector<1x130xi32>
    %48 = arith.cmpi slt, %44, %47 : vector<1x130xi32>
    %49 = arith.andi %46, %48 : vector<1x130xi1>
    %cst_25 = arith.constant 0.000000e+00 : f32
    %50 = vector.shape_cast %49 : vector<1x130xi1> to vector<1x130xi1>
    %51 = vector.broadcast %50 : vector<1x130xi1> to vector<8x130xi1>
    %52 = vector.broadcast %cst_25 : f32 to vector<8x130xf32>
    %53 = arith.select %51, %39, %52 : vector<8x130xi1>, vector<8x130xf32>
    %c0_26 = arith.constant 0 : index
    %c0_27 = arith.constant 0 : index
    %c0_28 = arith.constant 0 : index
    %54 = vector.load %arg7[%c0_26, %c0_27, %c0_28] : memref<3x8x8xf32, #tpu.memory_space<vmem>>, vector<1x8x8xf32>
    %55 = vector.shape_cast %54 : vector<1x8x8xf32> to vector<8x8xf32>
    %56 = vector.extract_strided_slice %53 {offsets = [0, 0], sizes = [8, 128], strides = [1, 1]} : vector<8x130xf32> to vector<8x128xf32>
    %cst_29 = arith.constant dense<0.000000e+00> : vector<8x128xf32>
    %57 = tpu.matmul %55, %56, %cst_29 {dimension_numbers = #tpu.dot_dimension_numbers<[1], [0], [0], [1], [0, 0, 1, 1], [], []>} : vector<8x8xf32>, vector<8x128xf32>, vector<8x128xf32> -> vector<8x128xf32>
    %c1_30 = arith.constant 1 : index
    %c0_31 = arith.constant 0 : index
    %c0_32 = arith.constant 0 : index
    %58 = vector.load %arg7[%c1_30, %c0_31, %c0_32] : memref<3x8x8xf32, #tpu.memory_space<vmem>>, vector<1x8x8xf32>
    %59 = vector.shape_cast %58 : vector<1x8x8xf32> to vector<8x8xf32>
    %60 = vector.extract_strided_slice %53 {offsets = [0, 1], sizes = [8, 128], strides = [1, 1]} : vector<8x130xf32> to vector<8x128xf32>
    %cst_33 = arith.constant dense<0.000000e+00> : vector<8x128xf32>
    %61 = tpu.matmul %59, %60, %cst_33 {dimension_numbers = #tpu.dot_dimension_numbers<[1], [0], [0], [1], [0, 0, 1, 1], [], []>} : vector<8x8xf32>, vector<8x128xf32>, vector<8x128xf32> -> vector<8x128xf32>
    %62 = arith.addf %57, %61 : vector<8x128xf32>
    %c2_34 = arith.constant 2 : index
    %c0_35 = arith.constant 0 : index
    %c0_36 = arith.constant 0 : index
    %63 = vector.load %arg7[%c2_34, %c0_35, %c0_36] : memref<3x8x8xf32, #tpu.memory_space<vmem>>, vector<1x8x8xf32>
    %64 = vector.shape_cast %63 : vector<1x8x8xf32> to vector<8x8xf32>
    %65 = vector.extract_strided_slice %53 {offsets = [0, 2], sizes = [8, 128], strides = [1, 1]} : vector<8x130xf32> to vector<8x128xf32>
    %cst_37 = arith.constant dense<0.000000e+00> : vector<8x128xf32>
    %66 = tpu.matmul %64, %65, %cst_37 {dimension_numbers = #tpu.dot_dimension_numbers<[1], [0], [0], [1], [0, 0, 1, 1], [], []>} : vector<8x8xf32>, vector<8x128xf32>, vector<8x128xf32> -> vector<8x128xf32>
    %67 = arith.addf %62, %66 : vector<8x128xf32>
    %c0_38 = arith.constant 0 : index
    %c0_39 = arith.constant 0 : index
    %68 = vector.load %arg8[%c0_38, %c0_39] : memref<8x1xf32, #tpu.memory_space<vmem>>, vector<8x1xf32>
    %69 = vector.broadcast %68 : vector<8x1xf32> to vector<8x128xf32>
    %70 = arith.addf %67, %69 : vector<8x128xf32>
    %71 = vector.extract_strided_slice %20 {offsets = [0, 128], sizes = [4, 128], strides = [1, 1]} : vector<4x384xf32> to vector<4x128xf32>
    %c0_40 = arith.constant 0 : index
    %c0_41 = arith.constant 0 : index
    %72 = vector.load %arg9[%c0_40, %c0_41] : memref<8x4xf32, #tpu.memory_space<vmem>>, vector<8x4xf32>
    %cst_42 = arith.constant dense<0.000000e+00> : vector<8x128xf32>
    %73 = tpu.matmul %72, %71, %cst_42 {dimension_numbers = #tpu.dot_dimension_numbers<[1], [0], [0], [1], [0, 0, 1, 1], [], []>} : vector<8x4xf32>, vector<4x128xf32>, vector<8x128xf32> -> vector<8x128xf32>
    %c0_43 = arith.constant 0 : index
    %c0_44 = arith.constant 0 : index
    %74 = vector.load %arg10[%c0_43, %c0_44] : memref<8x1xf32, #tpu.memory_space<vmem>>, vector<8x1xf32>
    %75 = vector.broadcast %74 : vector<8x1xf32> to vector<8x128xf32>
    %76 = arith.addf %73, %75 : vector<8x128xf32>
    %77 = arith.addf %70, %76 : vector<8x128xf32>
    %cst_45 = arith.constant 0.000000e+00 : f32
    %78 = vector.broadcast %cst_45 : f32 to vector<8x128xf32>
    %79 = arith.maximumf %77, %78 : vector<8x128xf32>
    %c0_46 = arith.constant 0 : index
    %c0_47 = arith.constant 0 : index
    %c0_48 = arith.constant 0 : index
    %80 = vector.load %arg11[%c0_46, %c0_47, %c0_48] : memref<1x8x128xf32, #tpu.memory_space<vmem>>, vector<1x8x128xf32>
    %81 = vector.shape_cast %80 : vector<1x8x128xf32> to vector<8x128xf32>
    %82 = vector.shape_cast %79 : vector<8x128xf32> to vector<1x8x128xf32>
    tpu.vector_store %arg11[%c0_46, %c0_47, %c0_48], %82 {strides = array<i32>} : memref<1x8x128xf32, #tpu.memory_space<vmem>>, vector<1x8x128xf32>,
    return
  }
  func.func @transform_0(%arg0: i32, %arg1: i32) -> (i32, i32, i32) {
    %c1_i32 = arith.constant 1 : i32
    %0 = arith.muli %arg1, %c1_i32 : i32
    %c1_i32_0 = arith.constant 1 : i32
    %1 = arith.subi %0, %c1_i32_0 : i32
    %c0_i32 = arith.constant 0 : i32
    %2 = arith.maxsi %1, %c0_i32 : i32
    %c0_i32_1 = arith.constant 0 : i32
    %c0_i32_2 = arith.constant 0 : i32
    return %arg0, %c0_i32_1, %2 : i32, i32, i32
  }
  func.func @transform_1(%arg0: i32, %arg1: i32) -> (i32, i32, i32) {
    %c0_i32 = arith.constant 0 : i32
    %c0_i32_0 = arith.constant 0 : i32
    return %arg0, %c0_i32, %arg1 : i32, i32, i32
  }
  func.func @transform_2(%arg0: i32, %arg1: i32) -> (i32, i32, i32) {
    %c1_i32 = arith.constant 1 : i32
    %0 = arith.muli %arg1, %c1_i32 : i32
    %c1_i32_0 = arith.constant 1 : i32
    %1 = arith.addi %0, %c1_i32_0 : i32
    %c0_i32 = arith.constant 0 : i32
    %2 = arith.minsi %1, %c0_i32 : i32
    %c0_i32_1 = arith.constant 0 : i32
    %c0_i32_2 = arith.constant 0 : i32
    return %arg0, %c0_i32_1, %2 : i32, i32, i32
  }
  func.func @transform_3(%arg0: i32, %arg1: i32) -> (i32, i32, i32) {
    %c0_i32 = arith.constant 0 : i32
    %c0_i32_0 = arith.constant 0 : i32
    %c0_i32_1 = arith.constant 0 : i32
    %c0_i32_2 = arith.constant 0 : i32
    return %c0_i32, %c0_i32_0, %c0_i32_1 : i32, i32, i32
  }
  func.func @transform_4(%arg0: i32, %arg1: i32) -> (i32, i32) {
    %c0_i32 = arith.constant 0 : i32
    %c0_i32_0 = arith.constant 0 : i32
    %c0_i32_1 = arith.constant 0 : i32
    return %c0_i32, %c0_i32_0 : i32, i32
  }
  func.func @transform_5(%arg0: i32, %arg1: i32) -> (i32, i32, i32) {
    %c0_i32 = arith.constant 0 : i32
    %c0_i32_0 = arith.constant 0 : i32
    %c0_i32_1 = arith.constant 0 : i32
    %c0_i32_2 = arith.constant 0 : i32
    return %c0_i32, %c0_i32_0, %c0_i32_1 : i32, i32, i32
  }
  func.func @transform_6(%arg0: i32, %arg1: i32) -> (i32, i32) {
    %c0_i32 = arith.constant 0 : i32
    %c0_i32_0 = arith.constant 0 : i32
    %c0_i32_1 = arith.constant 0 : i32
    return %c0_i32, %c0_i32_0 : i32, i32
  }
  func.func @transform_7(%arg0: i32, %arg1: i32) -> (i32, i32) {
    %c0_i32 = arith.constant 0 : i32
    %c0_i32_0 = arith.constant 0 : i32
    %c0_i32_1 = arith.constant 0 : i32
    return %c0_i32, %c0_i32_0 : i32, i32
  }
  func.func @transform_8(%arg0: i32, %arg1: i32) -> (i32, i32) {
    %c0_i32 = arith.constant 0 : i32
    %c0_i32_0 = arith.constant 0 : i32
    %c0_i32_1 = arith.constant 0 : i32
    return %c0_i32, %c0_i32_0 : i32, i32
  }
  func.func @transform_9(%arg0: i32, %arg1: i32) -> (i32, i32, i32) {
    %c0_i32 = arith.constant 0 : i32
    %c0_i32_0 = arith.constant 0 : i32
    return %arg0, %c0_i32, %arg1 : i32, i32, i32
  }
}

</mosaic_0001>

<bundles_post_ra>
// kernel: tpu_custom_call.1
= control target key start
LH: loop header
LB: loop body
LE: loop exit
PB: predicated region body
PF: predicated region fallthrough
CT: control target
= control target key end

     0   :  { %14 = vsyncpa [#allocation3], 0  ;;  %s1312_s0 = inlined_call_operand.vmem [shape: f32[2,4,16], index: 0, kind: input, shape index: {}]   ;;  %s1313_s1 = inlined_call_operand.vmem [shape: f32[2,4,16], index: 1, kind: input, shape index: {}]   ;;  %s1314_s2 = inlined_call_operand.vmem [shape: f32[2,4,16], index: 2, kind: input, shape index: {}]   ;;  %s1315_s3 = inlined_call_operand.vmem [shape: f32[3,8,4], index: 3, kind: input, shape index: {}]   ;;  %s1316_s4 = inlined_call_operand.vmem [shape: f32[8,1], index: 4, kind: input, shape index: {}]   ;;  %s1317_s5 = inlined_call_operand.vmem [shape: f32[3,8,8], index: 5, kind: input, shape index: {}]   ;;  %s1318_s6 = inlined_call_operand.vmem [shape: f32[8,1], index: 6, kind: input, shape index: {}]   ;;  %s1319_s7 = inlined_call_operand.vmem [shape: f32[8,4], index: 7, kind: input, shape index: {}]   ;;  %s1320_s8 = inlined_call_operand.vmem [shape: f32[8,1], index: 8, kind: input, shape index: {}]   ;;  %s1321_s9 = inlined_call_operand.hbm [shape: f32[2,8,16], index: 9, kind: output, shape index: {}]  }
   0x1   :  { %16 = vsyncpa [#allocation3 + $0x1], 0  ;;  %s1169_s28 = smov 0   ;;  %s1171_s29 = smov 0  }
   0x2   :  { %s1173_s30 = smov 0   ;;  %s1175_s10 = smov 0  }
   0x3   :  { %s1177_s11 = smov 0   ;;  %s1179_s12 = smov 0  }
   0x4 LB: > { %s926_s13 = sadd.s32 4294967295, %s1111_s12   ;;  %s927_s14 = sadd.s32 4294967294, %s1111_s12   ;;  %s1111_s12 = sphi %s1179_s12, %s22_s12   ;;  %s1107_s11 = sphi %s1177_s11, %s1328_s11   ;;  %s1103_s10 = sphi %s1175_s10, %s1327_s10   ;;  %s1099_s30 = sphi %s1173_s30, %s1326_s30   ;;  %s1095_s29 = sphi %s1171_s29, %s1325_s29   ;;  %s1091_s28 = sphi %s1169_s28, %s1324_s28  }
   0x5   : > { %s34_s15 = sadd.s32 1, %s1107_s11  ;;  %s265_s16 = sadd.s32 1, %s1099_s30 }
   0x6   : > { %p36_p0 = scmp.ge.s32.totalorder %s34_s15, 2  ;;  %p275_p1 = scmp.ne.s32.totalorder %s1099_s30, %s1095_s29 }
   0x7   : > { %p276_p2 = scmp.eq.s32.totalorder %s926_s13, 1  ;;  %p281_p3 = scmp.ne.s32.totalorder %s1095_s29, %s1091_s28 }
   0x8   : > { %s1330_s15 = smov (%p36_p0, %s34_s15), 0  ;;  %p282_p5 = scmp.eq.s32.totalorder %s927_s14, 1 }
   0x9   : > { %p1209_p4 = por %p276_p2, %p275_p1  ;;  %s260_s18 = ssub.s32 %s1107_s11, %s1330_s15 }
   0xa   : > { %p930_p6 = scmp.ge.s32.totalorder %s1111_s12, 1  ;;  %p263_p7 = scmp.eq.s32.totalorder %s260_s18, 0 }
   0xb   : > { %p1216_p8 = por %p282_p5, %p281_p3  ;;  %p360_p9 = scmp.lt.s32.totalorder %s1111_s12, 3 }
   0xc   : > { %s1222_s20 = scalar_select %p263_p7, %s1099_s30, %s265_s16  }
   0xd   : > { %p361_p10 = pnand %p930_p6, %p360_p9 }
   0xe   : > { %s1114_s23 = smov (!%p361_p10), 2   ;;  %s1115_s24 = smov (!%p361_p10), 1  }
   0xf   : > { %364 = sbr.rel (%p361_p10) target bundleno = 555 (0x22b), region = 56  ;;  %p431_p11 = scmp.lt.s32.totalorder (!%p361_p10), %s1103_s10, 1 }
  0x14   : > { %v456_v0 = vlaneseq  ;;  %v650_v1 = vld [vmem:[%s1316_s4] sm:$0xff]  ;;  %v1113_v2 = vmov 0.0   ;;  %v1116_v4 = vmov 0   ;;  %s432_s0 = scalar_select %p431_p11, %s1103_s10, 1  ;;  %vm501_vm1 = vcmask 1043456   ;;  %v935_v16 = vld [vmem:[%s1315_s3 + $0x8] sm:$0xff] }
  0x15   : > { %546 = vrot.lane.b32.xlu1 %v1113_v2, %s1114_s23  ;;  %488 = vrot.lane.b32.xlu0 %v1113_v2, %s1115_s24  ;;  %v768_v9 = vld [vmem:[%s1318_s6] sm:$0xff]  ;;  %vm494_vm2 = vcmask 7168   ;;  %vm550_vm3 = vcmask 15360   ;;  %vm497_vm4 = vcmask 31744   ;;  %v944_v21 = vld [vmem:[%s1315_s3 + $0x10] sm:$0xff]  ;;  %vm688_vm8 = vcmask 64512  }
  0x16   : > { %v457_v3 = vand.u32 127, %v456_v0  ;;  %1021 = vset.pattern.permute.xlu2 %v1116_v4  ;;  %1032 = vset.pattern.permute.xlu0 %v1116_v4  ;;  %s933_s25 = sshll.u32 %s432_s0, 2  ;;  %v482_v20 = vld [vmem:[%s1315_s3] sm:$0xff]  ;;  %s1117_s0 = smov 126   ;;  %vm685_vm9 = vcmask 1039360   ;;  %vm741_vm10 = vcmask 1031168  }
  0x17   : > { %653 = vperm.xlu2 %1021, %v650_v1   ;;  %s437_s2 = scalar_lea.vmem %s1313_s1, %s933_s25  ;;  %s1118_s25 = smov 127   ;;  %v676_v35 = vld [vmem:[%s1317_s5] sm:$0xff]  ;;  %v948_v44 = vld [vmem:[%s1317_s5 + $0x8] sm:$0xff]  ;;  %v952_v45 = vld [vmem:[%s1317_s5 + $0x10] sm:$0xff] }
  0x18   : > { %v458_v5 = vadd.s32 128, %v457_v3  ;;  %v454_v7 = vld [vmem:[%s437_s2] sm:$0xf]  ;;  %v662_v24 = vadd.s32 4294967295, %v457_v3 }
  0x19   : > { %v775_v36 = vld [vmem:[%s1319_s7] sm:$0xff] }
  0x1a   : > { %v462_v6 = vadd.s32 4294967168, %v458_v5  ;;  %vm664_vm5 = vcmp.ge.s32.totalorder %v662_v24, 0  ;;  %vm666_vm6 = vcmp.lt.s32.totalorder %v662_v24, 16  ;;  %v776_v37 = vld [vmem:[%s1320_s8] sm:$0xff] }
  0x1b   : > { %vm668_vm7 = vmand %vm664_vm5, %vm666_vm6 }
  0x1c   : > { %vm468_vm0 = vcmp.lt.s32.totalorder %v462_v6, 16 }
  0x1d   : > { %v480_v8 = vsel %vm468_vm0, %v454_v7, 0.0 }
  0x1e   : > { %548 = vrot.lane.b32.xlu1 %v480_v8, %s1114_s23  ;;  %490 = vrot.lane.b32.xlu0 %v480_v8, %s1115_s24 }
  0x1f   : > { %492 = vrot.lane.b32.xlu2 %v1113_v2, %s1115_s24  ;;  %s415_s24 = sand.u32 1, %s1095_s29  }
  0x20   : > { %s809_s18 = scalar_lea.sflag [#allocation3], %s415_s24 }
  0x27   : > { %771 = vperm.xlu2 %1021, %v768_v9  }
  0x71   : > { %v654_v10 = vpop.permute.xlu2 %653 }
  0x79   : > { %v493_v13 = vpop.permute.xlu2 %492 }
  0x81   : > { %v772_v56 = vpop.permute.xlu2 %771 }
  0x87   : > { %v547_v11 = vpop.permute.xlu1 %546  ;;  %v489_v12 = vpop.permute.xlu0 %488 }
  0x90   : > { %v549_v14 = vpop.permute.xlu1 %548  ;;  %v491_v15 = vpop.permute.xlu0 %490 }
  0x91   : > { %942 = vmatpush.msk.msra.mxu3 %vm501_vm1, %v549_v14  ;;  %v495_v17 = vsel %vm494_vm2, %v489_v12, %v491_v15  ;;  %v496_v18 = vsel %vm494_vm2, %v491_v15, %v493_v13  ;;  %v551_v19 = vsel %vm550_vm3, %v547_v11, %v549_v14 }
  0x92   : > { %936 = vmatpush.msk.msra.mxu0 %vm501_vm1, %v495_v17  ;;  %938 = vmatpush.msk.msra.mxu1 %vm501_vm1, %v496_v18 }
  0x93   : > { %940 = vmatpush.msk.msra.mxu2 %vm501_vm1, %v551_v19  ;;  %937 = vmatmul.msk.f32.vlgmr.msra.gmra.mxu0 %vm497_vm4, %v935_v16 }
  0x94   : > { %941 = vmatmul.msk.f32.vlgmr.msra.gmra.mxu2 %vm497_vm4, %v482_v20  ;;  %945 = vmatpush.msk.msrb.mxu0 %vm501_vm1, %v480_v8 }
  0x95   : > { %943 = vmatmul.msk.f32.vlgmr.msra.gmra.mxu3 %vm497_vm4, %v482_v20  ;;  %939 = vmatmul.msk.f32.vlgmr.msra.gmra.mxu1 %vm497_vm4, %v935_v16 }
  0x96   : > { %643 = vmatpush.msrb.mxu1 %v1113_v2 }
  0x98   : > { %954 = vmatpush.msk.msra.mxu1 %vm501_vm1, %v480_v8 }
  0x9b   : > { %946 = vmatmul.msk.f32.vlgmr.msrb.gmra.mxu0 %vm497_vm4, %v944_v21 }
  0x9d   : > { %947 = vmatmul.msk.f32.vlgmr.msrb.gmra.mxu1 %vm497_vm4, %v944_v21 }
  0xa5   : > { %955 = vmatmul.msk.f32.vlgmr.msra.gmra.mxu1 %vm497_vm4, %v775_v36 }
 0x110   : > { %v523_v22 = vpop.f32.mrf.mxu0 }
 0x112   : > { %v543_v23 = vpop.f32.mrf.mxu1 }
 0x117   : > { %v576_v25 = vpop.f32.mrf.mxu2 }
 0x118   : > { %v577_v26 = vadd.f32 %v576_v25, %v523_v22  ;;  %v625_v27 = vpop.f32.mrf.mxu0  ;;  %v596_v28 = vpop.f32.mrf.mxu3 }
 0x11a   : > { %v648_v29 = vadd.f32 %v625_v27, %v577_v26  ;;  %v645_v30 = vpop.f32.mrf.mxu1 }
 0x11c   : > { %v656_v31 = vadd.f32 %v654_v10, %v648_v29 }
 0x11e   : > { %v658_v32 = vmax.f32 %v656_v31, 0.0 }
 0x120   : > { %v674_v33 = vsel %vm668_vm7, %v658_v32, 0.0  ;;  %950 = vmatpush.msk.msrb.mxu3 %vm668_vm7, %v658_v32 }
 0x121   : > { %v1027_v34 = vpack.i.bf16 0.0, %v674_v33  ;;  %951 = vmatmul.msk.f32.vlgmr.msrb.gmra.mxu3 %vm688_vm8, %v676_v35 }
 0x122   : > { %v802_v49 = vpop.f32.mrf.mxu1 }
 0x123   : > { %1028 = vrot.lane.b32.xlu1 %v1027_v34, %s1117_s0  ;;  %1023 = vrot.lane.b32.xlu0 %v1027_v34, %s1118_s25  ;;  %s931_s0 = sshll.u32 %s415_s24, 3  ;;  %s957_s25 = sshll.u32 %s1103_s10, 3 }
 0x124   : > { %s820_s2 = scalar_lea.hbm %s1321_s9, %s957_s25  ;;  %s417_s13 = scalar_lea.vmem [#allocation2], %s931_s0 }
 0x125   : > { %s822_s14 = sshll.u32 %s417_s13, 4  ;;  %s824_s16 = sshll.u32 %s820_s2, 4  ;;  %s823_s14 = int_to_ptr.vmem [resolvable:$true] %s822_s14  ;;  %s825_s16 = int_to_ptr.hbm [resolvable:$true] %s824_s16 }
 0x126   : > { %s1047_s10 = sshra.s32 %s825_s16, 4  ;;  %s1053_s25 = scalar_lea.hbm %s1321_s9, 16  ;;  %s1048_s10 = int_to_ptr.hbm [resolvable:$true] %s1047_s10 }
 0x127   : > { %s1049_s21 = scalar_lea.hbm %s1048_s10, 8  ;;  %p1054_p1 = scmp.lt.s32.totalorder %s1048_s10, %s1321_s9 }
 0x128   : > { %p1050_p12 = scmp.ne.s32.totalorder %s1048_s10, %s1049_s21  ;;  %p1055_p2 = scmp.lt.s32.totalorder %s1053_s25, %s1049_s21 }
 0x12a   : > { %p1051_p13 = pnand %p1050_p12, %p1209_p4  ;;  %p1056_p3 = por %p1055_p2, %p1054_p1 }
 0x12b   : > { %779 = vperm.xlu0 %1032, %v776_v37  }
 0x12c   : > { %p1052_p0 = pneg %p1051_p13 }
 0x12e   : > { %p1057_p5 = pnand %p1056_p3, %p1052_p0 }
 0x195   : > { %v1029_v38 = vpop.permute.xlu1 %1028  ;;  %v1024_v39 = vpop.permute.xlu0 %1023 }
 0x196   : > { %v1031_v40 = vunpack.i.h.bf16 %v1029_v38  ;;  %v1030_v41 = vunpack.i.l.bf16 %v1029_v38  ;;  %v1026_v42 = vunpack.i.h.bf16 %v1024_v39  ;;  %v1025_v43 = vunpack.i.l.bf16 %v1024_v39 }
 0x198   : > { %v686_v46 = vsel %vm685_vm9, %v1025_v43, %v1026_v42  ;;  %v742_v47 = vsel %vm741_vm10, %v1030_v41, %v1031_v40 }
 0x199   : > { %707 = vmatpush.msrb.mxu2 %v686_v46  ;;  %762 = vmatpush.msra.mxu0 %v742_v47 }
 0x19a   : > { %949 = vmatmul.msk.f32.vlgmr.msrb.gmra.mxu2 %vm688_vm8, %v948_v44  ;;  %953 = vmatmul.msk.f32.vlgmr.msra.gmra.mxu0 %vm688_vm8, %v952_v45 }
 0x19d   : > { %v780_v50 = vpop.permute.xlu0 %779 }
 0x19e   : > { %v803_v55 = vadd.f32 %v802_v49, %v780_v50 }
 0x1a4   : > { %v732_v48 = vpop.f32.mrf.mxu3 }
 0x217   : > { %v764_v52 = vpop.f32.mrf.mxu0 }
 0x21d   : > { %v709_v51 = vpop.f32.mrf.mxu2 }
 0x21e   : > { %v733_v53 = vadd.f32 %v732_v48, %v709_v51 }
 0x220   : > { %v767_v54 = vadd.f32 %v764_v52, %v733_v53 }
 0x222   : > { %v774_v57 = vadd.f32 %v772_v56, %v767_v54 }
 0x224   : > { %v805_v58 = vadd.f32 %v803_v55, %v774_v57 }
 0x226   : > { %v806_v59 = vmax.f32 %v805_v58, 0.0 }
 0x228   : > { %807 = vst [vmem:[%s417_s13] sm:$0xff] %v806_v59 }
 0x229   : > { %1060 = shalt.err (!%p1057_p5)
}
 0x22a   : > { %960 = dma.vmem_to_hbm [thread:$0]  (%p1209_p4), %s823_s14, 128, %s825_s16, %s809_s18  }
 0x22b PF: > { %p966_p6 = scmp.ge.s32.totalorder %s1111_s12, 2  ;;  %s836_s24 = sand.u32 1, %s1091_s28  }
 0x22c   : > { %s837_s27 = scalar_lea.sflag [#allocation3], %s836_s24 }
 0x22d   : > { %p963_p7 = pnand %p966_p6, %p1216_p8 }
 0x22f   : > { %p964_p9 = pneg %p963_p7 }
 0x231   : > { %1086 = dma.done.wait (%p964_p9), %s837_s27, 128  }
 0x232   : > { %1088 = vsyncadd (%p964_p9), %s837_s27, 4294967168  ;;  %s22_s12 = sadd.s32 1, %s1111_s12   ;;  %s1324_s28 = smov %s1095_s29 }
 0x233   : > { %p19_p10 = scmp.ge.s32.totalorder %s22_s12, 4   ;;  %s1325_s29 = smov %s1099_s30 }
 0x234   : > { %s1326_s30 = smov %s1222_s20  ;;  %s1327_s10 = smov %s1107_s11 }
 0x235   : > { %s1328_s11 = smov %s1330_s15  ;;  %21 = sbr.rel (!%p19_p10) target bundleno = 4 (0x4), region = 101 }
 0x23a   :  { %843 = vsyncpa [#allocation3], 1 }
 0x23b   :  { %845 = vsyncpa [#allocation3 + $0x1], 1 }

</bundles_post_ra>
